<compile_context>
chip_gen: v6e
topology: v6e:2x2x1
jax: 0.10.0
libtpu: 0.0.40
codegen_flags: <defaults>
</compile_context>

<pallas_src>
import jax
import jax.numpy as jnp
from jax.experimental import pallas as pl
from jax.experimental.pallas import tpu as pltpu

_LANE = 128
_SUBLANE = 8


def _round_up(n, m):
    return ((n + m - 1) // m) * m


def _row_align(itemsize):
    # Sub-32-bit dtypes pack rows along sublanes: 8 rows (f32), 16 (bf16), 32 (int8/fp8).
    return _SUBLANE * max(1, 4 // int(itemsize))


def _pad2d(a, rows, cols):
    a = jnp.asarray(a)
    if a.ndim == 1:
        a = a.reshape(1, -1)
    r, c = a.shape
    return jnp.pad(a, ((0, rows - r), (0, cols - c)))


def mlp_kernel(x_ref, w1_ref, b1_ref, w2_ref, b2_ref, w3_ref, b3_ref,
               w4_ref, b4_ref, o_ref):
    """x: [TB, D_in]; weights lane-dense (feature dims padded to 128).

    Matmuls run in the streaming dtype (bf16 by default) with f32 MXU
    accumulation; biases are added and tanh is evaluated in f32.
    """
    cdt = w2_ref.dtype  # compute / streaming dtype

    # Layer 1: Linear(D_in, 24->128) + Tanh
    h = jnp.dot(x_ref[...], w1_ref[...],
                preferred_element_type=jnp.float32) + b1_ref[...]
    h = jnp.tanh(h).astype(cdt)

    # Layer 2: Linear(24->128, 10->128) + Tanh
    h = jnp.dot(h, w2_ref[...], preferred_element_type=jnp.float32) + b2_ref[...]
    h = jnp.tanh(h).astype(cdt)

    # Layer 3: Linear(10->128, 10->128) + Tanh
    h = jnp.dot(h, w3_ref[...], preferred_element_type=jnp.float32) + b3_ref[...]
    h = jnp.tanh(h).astype(cdt)

    # Layer 4: Linear(10->128, D_out->128)   (no activation)
    out = jnp.dot(h, w4_ref[...], preferred_element_type=jnp.float32) + b4_ref[...]
    o_ref[...] = out.astype(o_ref.dtype)


def _vmem_limit_bytes():
    """Explicit scoped-VMEM limit: generous on 128 MiB parts (v5e/v6e, whose
    defaults are only 16/32 MiB), conservative on v7x (64 MiB physical)."""
    phys = 64 * 1024 * 1024  # conservative fallback = v7x per-core VMEM
    try:
        phys = int(pltpu.get_tpu_info().vmem_capacity_bytes)
    except Exception:
        pass
    return max(32 * 1024 * 1024, min(phys - (16 << 20), 96 << 20))


def _pick_block_b(batch, d_in, d_out_p, x_item, out_item, weight_bytes,
                  vmem_budget, row_align):
    """Largest aligned batch tile such that the double-buffered x and output
    tiles plus the VMEM-resident weights fit in the budget."""
    avail = max(0, vmem_budget - weight_bytes)
    per_row = 2 * d_in * x_item + 2 * d_out_p * out_item
    tb = avail // max(1, per_row)
    tb = max(row_align, (tb // row_align) * row_align)
    tb = min(tb, 1024)                          # amortizes ~0.35us/step overhead
    tb = min(tb, _round_up(batch, row_align))   # don't tile bigger than the batch
    return tb


def neural_net_forward(x, params, *, block_b=None, compute_dtype=jnp.bfloat16):
    """Forward pass of NeuralNet.  x: [B, ...] (flattened to [B, D_in]).

    params: [(w1,b1),(w2,b2),(w3,b3),(w4,b4)] with w stored as [in, out].
    compute_dtype: streaming/MXU dtype (bf16 default, f32 accumulation);
    pass jnp.float32 for bit-faithful f32 numerics.  Returns f32 [B, D_out].
    """
    B = x.shape[0]
    x2d = x.reshape(B, -1).astype(compute_dtype)
    d_in = x2d.shape[1]
    x_item = jnp.dtype(compute_dtype).itemsize
    row_align = _row_align(x_item)

    (w1, b1), (w2, b2), (w3, b3), (w4, b4) = params
    d_out = jnp.asarray(w4).shape[-1]
    d_out_p = _round_up(d_out, _LANE)
    h_p = _LANE  # padded hidden width (24/10/10 -> 128)

    # Lane-dense, zero-padded parameters (exact on the real columns).
    # Weights in the compute dtype (single-pass MXU); biases stay f32.
    w1p = _pad2d(w1, d_in, h_p).astype(compute_dtype)
    b1p = _pad2d(b1, 1, h_p).astype(jnp.float32)
    w2p = _pad2d(w2, h_p, h_p).astype(compute_dtype)
    b2p = _pad2d(b2, 1, h_p).astype(jnp.float32)
    w3p = _pad2d(w3, h_p, h_p).astype(compute_dtype)
    b3p = _pad2d(b3, 1, h_p).astype(jnp.float32)
    w4p = _pad2d(w4, h_p, d_out_p).astype(compute_dtype)
    b4p = _pad2d(b4, 1, d_out_p).astype(jnp.float32)
    consts = (w1p, b1p, w2p, b2p, w3p, b3p, w4p, b4p)
    weight_bytes = sum(int(c.size) * c.dtype.itemsize for c in consts)

    out_dt = compute_dtype  # lane-padded writeback in the compute dtype
    out_item = jnp.dtype(out_dt).itemsize

    # Batch tiling: pipelined grid over row tiles, padded to a full last tile.
    vmem_limit = _vmem_limit_bytes()
    budget = vmem_limit - (8 << 20)  # headroom for Mosaic-internal scratch
    if block_b is None:
        # Conservatively count the weights twice in case single-buffering
        # (pl.Buffered(1)) is unavailable and they stay double-buffered.
        tb = _pick_block_b(B, d_in, d_out_p, x_item, out_item,
                           2 * weight_bytes, budget, row_align)
    else:
        tb = max(row_align, _round_up(block_b, row_align))
        tb = min(tb, _round_up(B, row_align))
    # NOTE: for flattened D_in so large that w1 alone overflows the VMEM
    # budget (>~32K on v7x), a K-tiled grid axis over D_in with an f32
    # accumulator scratch would be needed; not required at these model sizes.
    b_pad = _round_up(B, tb)
    if b_pad != B:
        x2d = jnp.pad(x2d, ((0, b_pad - B), (0, 0)))
    grid = (b_pad // tb,)

    # Advisory cost estimate so XLA schedules the surrounding reshape / final
    # slice sensibly around the custom call.
    flops = 2 * b_pad * (d_in * h_p + 2 * h_p * h_p + h_p * d_out_p)
    cost = pl.CostEstimate(
        flops=int(flops),
        transcendentals=int(3 * b_pad * h_p),
        bytes_accessed=int(b_pad * d_in * x_item + weight_bytes
                           + b_pad * d_out_p * out_item),
    )

    def call(single_buffer_weights):
        def const_spec(arr):
            nd = arr.ndim
            idx = lambda i, _nd=nd: (0,) * _nd
            if single_buffer_weights:
                # Block index never changes -> double-buffering only wastes
                # VMEM (matters inside v7x's 64 MiB for large D_in).
                return pl.BlockSpec(arr.shape, idx,
                                    pipeline_mode=pl.Buffered(1))
            return pl.BlockSpec(arr.shape, idx)

        return pl.pallas_call(
            mlp_kernel,
            out_shape=jax.ShapeDtypeStruct((b_pad, d_out_p), out_dt),
            grid=grid,
            in_specs=[pl.BlockSpec((tb, d_in), lambda i: (i, 0))]  # streamed x
                     + [const_spec(c) for c in consts],
            out_specs=pl.BlockSpec((tb, d_out_p), lambda i: (i, 0)),
            compiler_params=pltpu.CompilerParams(
                dimension_semantics=("parallel",),      # megacore sharding
                vmem_limit_bytes=int(vmem_limit)),
            cost_estimate=cost,
        )(x2d, *consts)

    try:
        out = call(True)
    except Exception:
        # pipeline_mode=pl.Buffered(1) unsupported on this jax/libtpu build:
        # fall back to default (double-buffered) constant specs.
        out = call(False)

    # Drop batch/lane padding; return f32 like the PyTorch module's forward.
    return out[:B, :d_out].astype(jnp.float32)


def init_params(key, d_in, d_out):
    """Deterministic init mirroring nn.Linear shapes (stored as [in, out])."""
    dims = [(d_in, 24), (24, 10), (10, 10), (10, d_out)]
    params = []
    for i, (fan_in, fan_out) in enumerate(dims):
        kw, kb = jax.random.split(jax.random.fold_in(key, i))
        bound = 1.0 / (fan_in ** 0.5)  # PyTorch Linear default init range
        w = jax.random.uniform(kw, (fan_in, fan_out), jnp.float32, -bound, bound)
        b = jax.random.uniform(kb, (1, fan_out), jnp.float32, -bound, bound)
        params.append((w, b))
    return params


def _reference(x, params):
    ref = x.reshape(x.shape[0], -1).astype(jnp.float32)
    for i, (w, b) in enumerate(params):
        ref = ref @ w + b
        if i < 3:
            ref = jnp.tanh(ref)
    return ref


if __name__ == "__main__":
    key = jax.random.PRNGKey(0)
    k_x, k_p = jax.random.split(key)

    # Small example: batch=2, input [2, 4, 8] -> flatten to D_in=32, y_shape=10
    B, C, H = 2, 4, 8
    d_in = C * H
    d_out = 10

    x = jax.random.normal(k_x, (B, C, H), dtype=jnp.float32)
    params = init_params(k_p, d_in, d_out)
    ref = _reference(x, params)

    # 1) Default bf16 streaming path (perf mode): loose tolerance vs f32 ref.
    out = jax.block_until_ready(neural_net_forward(x, params))
    assert out.shape == (B, d_out) and out.dtype == jnp.float32
    assert jnp.allclose(out, ref, atol=3e-2, rtol=3e-2)

    # 2) Exact f32 path matches the f32 reference tightly.
    out_f32 = jax.block_until_ready(
        neural_net_forward(x, params, compute_dtype=jnp.float32))
    assert jnp.allclose(out_f32, ref, atol=1e-5, rtol=1e-5)

    # 3) Multi-tile pipelined grid with a ragged (padded) last tile.
    B2 = 20
    x2 = jax.random.normal(jax.random.fold_in(k_x, 1), (B2, C, H),
                           dtype=jnp.float32)
    out2 = jax.block_until_ready(neural_net_forward(x2, params, block_b=16))
    ref2 = _reference(x2, params)
    assert out2.shape == (B2, d_out)
    assert jnp.allclose(out2, ref2, atol=3e-2, rtol=3e-2)

    print("KERNEL_OK")
</pallas_src>

<mosaic_0001>
module attributes {stable_mosaic.version = 11 : i64} {
  func.func @mlp_kernel(%arg0: i32, %arg1: memref<16x32xbf16, #tpu.memory_space<vmem>>, %arg2: memref<32x128xbf16, #tpu.memory_space<vmem>>, %arg3: memref<1x128xf32, #tpu.memory_space<vmem>>, %arg4: memref<128x128xbf16, #tpu.memory_space<vmem>>, %arg5: memref<1x128xf32, #tpu.memory_space<vmem>>, %arg6: memref<128x128xbf16, #tpu.memory_space<vmem>>, %arg7: memref<1x128xf32, #tpu.memory_space<vmem>>, %arg8: memref<128x128xbf16, #tpu.memory_space<vmem>>, %arg9: memref<1x128xf32, #tpu.memory_space<vmem>>, %arg10: memref<16x128xbf16, #tpu.memory_space<vmem>>) attributes {dimension_semantics = [#tpu.dimension_semantics<parallel>], iteration_bounds = array<i64: 1>, scalar_prefetch = 0 : i64, scratch_operands = 0 : i64, tpu.core_type = #tpu.core_type<tc>, window_params = [{transform_indices = @transform_0, window_bounds = array<i64: 16, 32>}, {pipeline_mode = #tpu.pipeline_mode<synchronous>, transform_indices = @transform_1, window_bounds = array<i64: 32, 128>}, {pipeline_mode = #tpu.pipeline_mode<synchronous>, transform_indices = @transform_2, window_bounds = array<i64: 1, 128>}, {pipeline_mode = #tpu.pipeline_mode<synchronous>, transform_indices = @transform_3, window_bounds = array<i64: 128, 128>}, {pipeline_mode = #tpu.pipeline_mode<synchronous>, transform_indices = @transform_4, window_bounds = array<i64: 1, 128>}, {pipeline_mode = #tpu.pipeline_mode<synchronous>, transform_indices = @transform_5, window_bounds = array<i64: 128, 128>}, {pipeline_mode = #tpu.pipeline_mode<synchronous>, transform_indices = @transform_6, window_bounds = array<i64: 1, 128>}, {pipeline_mode = #tpu.pipeline_mode<synchronous>, transform_indices = @transform_7, window_bounds = array<i64: 128, 128>}, {pipeline_mode = #tpu.pipeline_mode<synchronous>, transform_indices = @transform_8, window_bounds = array<i64: 1, 128>}, {transform_indices = @transform_9, window_bounds = array<i64: 16, 128>}]} {
    %c0 = arith.constant 0 : index
    %c0_0 = arith.constant 0 : index
    %0 = vector.load %arg1[%c0, %c0_0] : memref<16x32xbf16, #tpu.memory_space<vmem>>, vector<16x32xbf16>
    %c0_1 = arith.constant 0 : index
    %c0_2 = arith.constant 0 : index
    %1 = vector.load %arg2[%c0_1, %c0_2] : memref<32x128xbf16, #tpu.memory_space<vmem>>, vector<32x128xbf16>
    %cst = arith.constant dense<0.000000e+00> : vector<16x128xf32>
    %2 = tpu.matmul %0, %1, %cst {dimension_numbers = #tpu.dot_dimension_numbers<[1], [0], [0], [1], [0, 0, 1, 1], [], []>} : vector<16x32xbf16>, vector<32x128xbf16>, vector<16x128xf32> -> vector<16x128xf32>
    %c0_3 = arith.constant 0 : index
    %c0_4 = arith.constant 0 : index
    %3 = vector.load %arg3[%c0_3, %c0_4] : memref<1x128xf32, #tpu.memory_space<vmem>>, vector<1x128xf32>
    %4 = vector.broadcast %3 : vector<1x128xf32> to vector<16x128xf32>
    %5 = arith.addf %2, %4 : vector<16x128xf32>
    %6 = math.tanh %5 : vector<16x128xf32>
    %7 = arith.truncf %6 : vector<16x128xf32> to vector<16x128xbf16>
    %c0_5 = arith.constant 0 : index
    %c0_6 = arith.constant 0 : index
    %8 = vector.load %arg4[%c0_5, %c0_6] : memref<128x128xbf16, #tpu.memory_space<vmem>>, vector<128x128xbf16>
    %cst_7 = arith.constant dense<0.000000e+00> : vector<16x128xf32>
    %9 = tpu.matmul %7, %8, %cst_7 {dimension_numbers = #tpu.dot_dimension_numbers<[1], [0], [0], [1], [0, 0, 1, 1], [], []>} : vector<16x128xbf16>, vector<128x128xbf16>, vector<16x128xf32> -> vector<16x128xf32>
    %c0_8 = arith.constant 0 : index
    %c0_9 = arith.constant 0 : index
    %10 = vector.load %arg5[%c0_8, %c0_9] : memref<1x128xf32, #tpu.memory_space<vmem>>, vector<1x128xf32>
    %11 = vector.broadcast %10 : vector<1x128xf32> to vector<16x128xf32>
    %12 = arith.addf %9, %11 : vector<16x128xf32>
    %13 = math.tanh %12 : vector<16x128xf32>
    %14 = arith.truncf %13 : vector<16x128xf32> to vector<16x128xbf16>
    %c0_10 = arith.constant 0 : index
    %c0_11 = arith.constant 0 : index
    %15 = vector.load %arg6[%c0_10, %c0_11] : memref<128x128xbf16, #tpu.memory_space<vmem>>, vector<128x128xbf16>
    %cst_12 = arith.constant dense<0.000000e+00> : vector<16x128xf32>
    %16 = tpu.matmul %14, %15, %cst_12 {dimension_numbers = #tpu.dot_dimension_numbers<[1], [0], [0], [1], [0, 0, 1, 1], [], []>} : vector<16x128xbf16>, vector<128x128xbf16>, vector<16x128xf32> -> vector<16x128xf32>
    %c0_13 = arith.constant 0 : index
    %c0_14 = arith.constant 0 : index
    %17 = vector.load %arg7[%c0_13, %c0_14] : memref<1x128xf32, #tpu.memory_space<vmem>>, vector<1x128xf32>
    %18 = vector.broadcast %17 : vector<1x128xf32> to vector<16x128xf32>
    %19 = arith.addf %16, %18 : vector<16x128xf32>
    %20 = math.tanh %19 : vector<16x128xf32>
    %21 = arith.truncf %20 : vector<16x128xf32> to vector<16x128xbf16>
    %c0_15 = arith.constant 0 : index
    %c0_16 = arith.constant 0 : index
    %22 = vector.load %arg8[%c0_15, %c0_16] : memref<128x128xbf16, #tpu.memory_space<vmem>>, vector<128x128xbf16>
    %cst_17 = arith.constant dense<0.000000e+00> : vector<16x128xf32>
    %23 = tpu.matmul %21, %22, %cst_17 {dimension_numbers = #tpu.dot_dimension_numbers<[1], [0], [0], [1], [0, 0, 1, 1], [], []>} : vector<16x128xbf16>, vector<128x128xbf16>, vector<16x128xf32> -> vector<16x128xf32>
    %c0_18 = arith.constant 0 : index
    %c0_19 = arith.constant 0 : index
    %24 = vector.load %arg9[%c0_18, %c0_19] : memref<1x128xf32, #tpu.memory_space<vmem>>, vector<1x128xf32>
    %25 = vector.broadcast %24 : vector<1x128xf32> to vector<16x128xf32>
    %26 = arith.addf %23, %25 : vector<16x128xf32>
    %27 = arith.truncf %26 : vector<16x128xf32> to vector<16x128xbf16>
    %c0_20 = arith.constant 0 : index
    %c0_21 = arith.constant 0 : index
    %28 = vector.load %arg10[%c0_20, %c0_21] : memref<16x128xbf16, #tpu.memory_space<vmem>>, vector<16x128xbf16>
    tpu.vector_store %arg10[%c0_20, %c0_21], %27 {strides = array<i32>} : memref<16x128xbf16, #tpu.memory_space<vmem>>, vector<16x128xbf16>,
    return
  }
  func.func @transform_0(%arg0: i32) -> (i32, i32) {
    %c0_i32 = arith.constant 0 : i32
    %c0_i32_0 = arith.constant 0 : i32
    return %arg0, %c0_i32 : i32, i32
  }
  func.func @transform_1(%arg0: i32) -> (i32, i32) {
    %c0_i32 = arith.constant 0 : i32
    %c0_i32_0 = arith.constant 0 : i32
    %c0_i32_1 = arith.constant 0 : i32
    return %c0_i32, %c0_i32_0 : i32, i32
  }
  func.func @transform_2(%arg0: i32) -> (i32, i32) {
    %c0_i32 = arith.constant 0 : i32
    %c0_i32_0 = arith.constant 0 : i32
    %c0_i32_1 = arith.constant 0 : i32
    return %c0_i32, %c0_i32_0 : i32, i32
  }
  func.func @transform_3(%arg0: i32) -> (i32, i32) {
    %c0_i32 = arith.constant 0 : i32
    %c0_i32_0 = arith.constant 0 : i32
    %c0_i32_1 = arith.constant 0 : i32
    return %c0_i32, %c0_i32_0 : i32, i32
  }
  func.func @transform_4(%arg0: i32) -> (i32, i32) {
    %c0_i32 = arith.constant 0 : i32
    %c0_i32_0 = arith.constant 0 : i32
    %c0_i32_1 = arith.constant 0 : i32
    return %c0_i32, %c0_i32_0 : i32, i32
  }
  func.func @transform_5(%arg0: i32) -> (i32, i32) {
    %c0_i32 = arith.constant 0 : i32
    %c0_i32_0 = arith.constant 0 : i32
    %c0_i32_1 = arith.constant 0 : i32
    return %c0_i32, %c0_i32_0 : i32, i32
  }
  func.func @transform_6(%arg0: i32) -> (i32, i32) {
    %c0_i32 = arith.constant 0 : i32
    %c0_i32_0 = arith.constant 0 : i32
    %c0_i32_1 = arith.constant 0 : i32
    return %c0_i32, %c0_i32_0 : i32, i32
  }
  func.func @transform_7(%arg0: i32) -> (i32, i32) {
    %c0_i32 = arith.constant 0 : i32
    %c0_i32_0 = arith.constant 0 : i32
    %c0_i32_1 = arith.constant 0 : i32
    return %c0_i32, %c0_i32_0 : i32, i32
  }
  func.func @transform_8(%arg0: i32) -> (i32, i32) {
    %c0_i32 = arith.constant 0 : i32
    %c0_i32_0 = arith.constant 0 : i32
    %c0_i32_1 = arith.constant 0 : i32
    return %c0_i32, %c0_i32_0 : i32, i32
  }
  func.func @transform_9(%arg0: i32) -> (i32, i32) {
    %c0_i32 = arith.constant 0 : i32
    %c0_i32_0 = arith.constant 0 : i32
    return %arg0, %c0_i32 : i32, i32
  }
}

module attributes {stable_mosaic.version = 11 : i64} {
  func.func @mlp_kernel(%arg0: i32, %arg1: memref<16x32xbf16, #tpu.memory_space<vmem>>, %arg2: memref<32x128xbf16, #tpu.memory_space<vmem>>, %arg3: memref<1x128xf32, #tpu.memory_space<vmem>>, %arg4: memref<128x128xbf16, #tpu.memory_space<vmem>>, %arg5: memref<1x128xf32, #tpu.memory_space<vmem>>, %arg6: memref<128x128xbf16, #tpu.memory_space<vmem>>, %arg7: memref<1x128xf32, #tpu.memory_space<vmem>>, %arg8: memref<128x128xbf16, #tpu.memory_space<vmem>>, %arg9: memref<1x128xf32, #tpu.memory_space<vmem>>, %arg10: memref<16x128xbf16, #tpu.memory_space<vmem>>) attributes {dimension_semantics = [#tpu.dimension_semantics<parallel>], iteration_bounds = array<i64: 1>, scalar_prefetch = 0 : i64, scratch_operands = 0 : i64, tpu.core_type = #tpu.core_type<tc>, window_params = [{transform_indices = @transform_0, window_bounds = array<i64: 16, 32>}, {pipeline_mode = #tpu.pipeline_mode<synchronous>, transform_indices = @transform_1, window_bounds = array<i64: 32, 128>}, {pipeline_mode = #tpu.pipeline_mode<synchronous>, transform_indices = @transform_2, window_bounds = array<i64: 1, 128>}, {pipeline_mode = #tpu.pipeline_mode<synchronous>, transform_indices = @transform_3, window_bounds = array<i64: 128, 128>}, {pipeline_mode = #tpu.pipeline_mode<synchronous>, transform_indices = @transform_4, window_bounds = array<i64: 1, 128>}, {pipeline_mode = #tpu.pipeline_mode<synchronous>, transform_indices = @transform_5, window_bounds = array<i64: 128, 128>}, {pipeline_mode = #tpu.pipeline_mode<synchronous>, transform_indices = @transform_6, window_bounds = array<i64: 1, 128>}, {pipeline_mode = #tpu.pipeline_mode<synchronous>, transform_indices = @transform_7, window_bounds = array<i64: 128, 128>}, {pipeline_mode = #tpu.pipeline_mode<synchronous>, transform_indices = @transform_8, window_bounds = array<i64: 1, 128>}, {transform_indices = @transform_9, window_bounds = array<i64: 16, 128>}]} {
    %c0 = arith.constant 0 : index
    %c0_0 = arith.constant 0 : index
    %0 = vector.load %arg1[%c0, %c0_0] : memref<16x32xbf16, #tpu.memory_space<vmem>>, vector<16x32xbf16>
    %c0_1 = arith.constant 0 : index
    %c0_2 = arith.constant 0 : index
    %1 = vector.load %arg2[%c0_1, %c0_2] : memref<32x128xbf16, #tpu.memory_space<vmem>>, vector<32x128xbf16>
    %cst = arith.constant dense<0.000000e+00> : vector<16x128xf32>
    %2 = tpu.matmul %0, %1, %cst {dimension_numbers = #tpu.dot_dimension_numbers<[1], [0], [0], [1], [0, 0, 1, 1], [], []>} : vector<16x32xbf16>, vector<32x128xbf16>, vector<16x128xf32> -> vector<16x128xf32>
    %c0_3 = arith.constant 0 : index
    %c0_4 = arith.constant 0 : index
    %3 = vector.load %arg3[%c0_3, %c0_4] : memref<1x128xf32, #tpu.memory_space<vmem>>, vector<1x128xf32>
    %4 = vector.broadcast %3 : vector<1x128xf32> to vector<16x128xf32>
    %5 = arith.addf %2, %4 : vector<16x128xf32>
    %6 = math.tanh %5 : vector<16x128xf32>
    %7 = arith.truncf %6 : vector<16x128xf32> to vector<16x128xbf16>
    %c0_5 = arith.constant 0 : index
    %c0_6 = arith.constant 0 : index
    %8 = vector.load %arg4[%c0_5, %c0_6] : memref<128x128xbf16, #tpu.memory_space<vmem>>, vector<128x128xbf16>
    %cst_7 = arith.constant dense<0.000000e+00> : vector<16x128xf32>
    %9 = tpu.matmul %7, %8, %cst_7 {dimension_numbers = #tpu.dot_dimension_numbers<[1], [0], [0], [1], [0, 0, 1, 1], [], []>} : vector<16x128xbf16>, vector<128x128xbf16>, vector<16x128xf32> -> vector<16x128xf32>
    %c0_8 = arith.constant 0 : index
    %c0_9 = arith.constant 0 : index
    %10 = vector.load %arg5[%c0_8, %c0_9] : memref<1x128xf32, #tpu.memory_space<vmem>>, vector<1x128xf32>
    %11 = vector.broadcast %10 : vector<1x128xf32> to vector<16x128xf32>
    %12 = arith.addf %9, %11 : vector<16x128xf32>
    %13 = math.tanh %12 : vector<16x128xf32>
    %14 = arith.truncf %13 : vector<16x128xf32> to vector<16x128xbf16>
    %c0_10 = arith.constant 0 : index
    %c0_11 = arith.constant 0 : index
    %15 = vector.load %arg6[%c0_10, %c0_11] : memref<128x128xbf16, #tpu.memory_space<vmem>>, vector<128x128xbf16>
    %cst_12 = arith.constant dense<0.000000e+00> : vector<16x128xf32>
    %16 = tpu.matmul %14, %15, %cst_12 {dimension_numbers = #tpu.dot_dimension_numbers<[1], [0], [0], [1], [0, 0, 1, 1], [], []>} : vector<16x128xbf16>, vector<128x128xbf16>, vector<16x128xf32> -> vector<16x128xf32>
    %c0_13 = arith.constant 0 : index
    %c0_14 = arith.constant 0 : index
    %17 = vector.load %arg7[%c0_13, %c0_14] : memref<1x128xf32, #tpu.memory_space<vmem>>, vector<1x128xf32>
    %18 = vector.broadcast %17 : vector<1x128xf32> to vector<16x128xf32>
    %19 = arith.addf %16, %18 : vector<16x128xf32>
    %20 = math.tanh %19 : vector<16x128xf32>
    %21 = arith.truncf %20 : vector<16x128xf32> to vector<16x128xbf16>
    %c0_15 = arith.constant 0 : index
    %c0_16 = arith.constant 0 : index
    %22 = vector.load %arg8[%c0_15, %c0_16] : memref<128x128xbf16, #tpu.memory_space<vmem>>, vector<128x128xbf16>
    %cst_17 = arith.constant dense<0.000000e+00> : vector<16x128xf32>
    %23 = tpu.matmul %21, %22, %cst_17 {dimension_numbers = #tpu.dot_dimension_numbers<[1], [0], [0], [1], [0, 0, 1, 1], [], []>} : vector<16x128xbf16>, vector<128x128xbf16>, vector<16x128xf32> -> vector<16x128xf32>
    %c0_18 = arith.constant 0 : index
    %c0_19 = arith.constant 0 : index
    %24 = vector.load %arg9[%c0_18, %c0_19] : memref<1x128xf32, #tpu.memory_space<vmem>>, vector<1x128xf32>
    %25 = vector.broadcast %24 : vector<1x128xf32> to vector<16x128xf32>
    %26 = arith.addf %23, %25 : vector<16x128xf32>
    %27 = arith.truncf %26 : vector<16x128xf32> to vector<16x128xbf16>
    %c0_20 = arith.constant 0 : index
    %c0_21 = arith.constant 0 : index
    %28 = vector.load %arg10[%c0_20, %c0_21] : memref<16x128xbf16, #tpu.memory_space<vmem>>, vector<16x128xbf16>
    tpu.vector_store %arg10[%c0_20, %c0_21], %27 {strides = array<i32>} : memref<16x128xbf16, #tpu.memory_space<vmem>>, vector<16x128xbf16>,
    return
  }
  func.func @transform_0(%arg0: i32) -> (i32, i32) {
    %c0_i32 = arith.constant 0 : i32
    %c0_i32_0 = arith.constant 0 : i32
    return %arg0, %c0_i32 : i32, i32
  }
  func.func @transform_1(%arg0: i32) -> (i32, i32) {
    %c0_i32 = arith.constant 0 : i32
    %c0_i32_0 = arith.constant 0 : i32
    %c0_i32_1 = arith.constant 0 : i32
    return %c0_i32, %c0_i32_0 : i32, i32
  }
  func.func @transform_2(%arg0: i32) -> (i32, i32) {
    %c0_i32 = arith.constant 0 : i32
    %c0_i32_0 = arith.constant 0 : i32
    %c0_i32_1 = arith.constant 0 : i32
    return %c0_i32, %c0_i32_0 : i32, i32
  }
  func.func @transform_3(%arg0: i32) -> (i32, i32) {
    %c0_i32 = arith.constant 0 : i32
    %c0_i32_0 = arith.constant 0 : i32
    %c0_i32_1 = arith.constant 0 : i32
    return %c0_i32, %c0_i32_0 : i32, i32
  }
  func.func @transform_4(%arg0: i32) -> (i32, i32) {
    %c0_i32 = arith.constant 0 : i32
    %c0_i32_0 = arith.constant 0 : i32
    %c0_i32_1 = arith.constant 0 : i32
    return %c0_i32, %c0_i32_0 : i32, i32
  }
  func.func @transform_5(%arg0: i32) -> (i32, i32) {
    %c0_i32 = arith.constant 0 : i32
    %c0_i32_0 = arith.constant 0 : i32
    %c0_i32_1 = arith.constant 0 : i32
    return %c0_i32, %c0_i32_0 : i32, i32
  }
  func.func @transform_6(%arg0: i32) -> (i32, i32) {
    %c0_i32 = arith.constant 0 : i32
    %c0_i32_0 = arith.constant 0 : i32
    %c0_i32_1 = arith.constant 0 : i32
    return %c0_i32, %c0_i32_0 : i32, i32
  }
  func.func @transform_7(%arg0: i32) -> (i32, i32) {
    %c0_i32 = arith.constant 0 : i32
    %c0_i32_0 = arith.constant 0 : i32
    %c0_i32_1 = arith.constant 0 : i32
    return %c0_i32, %c0_i32_0 : i32, i32
  }
  func.func @transform_8(%arg0: i32) -> (i32, i32) {
    %c0_i32 = arith.constant 0 : i32
    %c0_i32_0 = arith.constant 0 : i32
    %c0_i32_1 = arith.constant 0 : i32
    return %c0_i32, %c0_i32_0 : i32, i32
  }
  func.func @transform_9(%arg0: i32) -> (i32, i32) {
    %c0_i32 = arith.constant 0 : i32
    %c0_i32_0 = arith.constant 0 : i32
    return %arg0, %c0_i32 : i32, i32
  }
}

</mosaic_0001>

<bundles_post_ra>
// kernel: tpu_custom_call.1
= control target key start
LH: loop header
LB: loop body
LE: loop exit
PB: predicated region body
PF: predicated region fallthrough
CT: control target
= control target key end

     0   :  { %14 = vsyncpa [#allocation3], 0  ;;  %s1009_s0 = inlined_call_operand.hbm [shape: bf16[16,32], index: 0, kind: input, shape index: {}]   ;;  %s1010_s1 = inlined_call_operand.hbm [shape: bf16[32,128], index: 1, kind: input, shape index: {}]   ;;  %s1011_s2 = inlined_call_operand.vmem [shape: f32[1,128], index: 2, kind: input, shape index: {}]   ;;  %s1012_s3 = inlined_call_operand.hbm [shape: bf16[128,128], index: 3, kind: input, shape index: {}]   ;;  %s1013_s4 = inlined_call_operand.vmem [shape: f32[1,128], index: 4, kind: input, shape index: {}]   ;;  %s1014_s5 = inlined_call_operand.hbm [shape: bf16[128,128], index: 5, kind: input, shape index: {}]   ;;  %s1015_s6 = inlined_call_operand.vmem [shape: f32[1,128], index: 6, kind: input, shape index: {}]   ;;  %s1016_s7 = inlined_call_operand.hbm [shape: bf16[128,128], index: 7, kind: input, shape index: {}]   ;;  %s1017_s8 = inlined_call_operand.vmem [shape: f32[1,128], index: 8, kind: input, shape index: {}]   ;;  %s1018_s9 = inlined_call_operand.hbm [shape: bf16[16,128], index: 9, kind: output, shape index: {}]  }
   0x1   :  { %15 = vsyncpa [#allocation6], 0 }
   0x2   :  { %16 = vsyncpa [#allocation9], 0 }
   0x3   :  { %17 = vsyncpa [#allocation4], 0  ;;  %s867_s30 = smov [#allocation5]   ;;  %s868_s11 = smov [#allocation8]  }
   0x4   :  { %s35_s10 = sshll.u32 %s867_s30, 4  ;;  %s63_s12 = sshll.u32 %s868_s11, 4  ;;  %s36_s10 = int_to_ptr.vmem [resolvable:$true] %s35_s10  ;;  %s64_s12 = int_to_ptr.vmem [resolvable:$true] %s63_s12 }
   0x5   :  { %s747_s13 = scalar_lea.vmem %s36_s10, 256  ;;  %p752_p1 = scmp.lt.s32.totalorder %s36_s10, %s36_s10 }
   0x6   :  { %p748_p0 = scmp.ne.s32.totalorder %s36_s10, %s747_s13  ;;  %p753_p2 = scmp.lt.s32.totalorder %s747_s13, %s747_s13 }
   0x8   :  { %p754_p3 = por %p753_p2, %p752_p1 }
   0xa   :  { %p755_p4 = pnand %p754_p3, %p748_p0 }
   0xc   :  { %758 = shalt.err (!%p755_p4)
}
   0xd   :  { %s869_s14 = smov 64   ;;  %s870_s15 = smov 4  }
   0xe   :  { %41 = dma.hbm_to_vmem [thread:$0]  %s1010_s1, 256, %s36_s10, [#allocation6], %s869_s14, %s869_s14, %s870_s15  }
   0xf   :  { %s767_s18 = scalar_lea.vmem %s64_s12, 1024  ;;  %p772_p6 = scmp.lt.s32.totalorder %s64_s12, %s64_s12 }
  0x10   :  { %p768_p5 = scmp.ne.s32.totalorder %s64_s12, %s767_s18  ;;  %p773_p7 = scmp.lt.s32.totalorder %s767_s18, %s767_s18 }
  0x12   :  { %p774_p8 = por %p773_p7, %p772_p6 }
  0x14   :  { %p775_p9 = pnand %p774_p8, %p768_p5 }
  0x16   :  { %778 = shalt.err (!%p775_p9)
}
  0x17   :  { %69 = dma.hbm_to_vmem [thread:$0]  %s1014_s5, 1024, %s64_s12, [#allocation9], %s869_s14, %s869_s14, %s870_s15  }
  0x18   :  { %s871_s21 = smov [#allocation2]   ;;  %s872_s23 = smov [#allocation7]  }
  0x19   :  { %s23_s22 = sshll.u32 %s871_s21, 4  ;;  %s49_s24 = sshll.u32 %s872_s23, 4  ;;  %s24_s22 = int_to_ptr.vmem [resolvable:$true] %s23_s22  ;;  %s50_s24 = int_to_ptr.vmem [resolvable:$true] %s49_s24 }
  0x1a   :  { %s787_s1 = scalar_lea.vmem %s24_s22, 128  ;;  %p792_p11 = scmp.lt.s32.totalorder %s24_s22, %s24_s22 }
  0x1b   :  { %p788_p10 = scmp.ne.s32.totalorder %s24_s22, %s787_s1  ;;  %p793_p12 = scmp.lt.s32.totalorder %s787_s1, %s787_s1 }
  0x1d   :  { %p794_p13 = por %p793_p12, %p792_p11 }
  0x1f   :  { %p795_p0 = pnand %p794_p13, %p788_p10 }
  0x21   :  { %798 = shalt.err (!%p795_p0)
}
  0x22   :  { %29 = dma.hbm_to_vmem [thread:$0]  %s1009_s0, 128, %s24_s22, [#allocation3], %s869_s14, %s869_s14, %s870_s15  }
  0x23   :  { %s807_s5 = scalar_lea.vmem %s50_s24, 1024  ;;  %p812_p2 = scmp.lt.s32.totalorder %s50_s24, %s50_s24 }
  0x24   :  { %p808_p1 = scmp.ne.s32.totalorder %s50_s24, %s807_s5  ;;  %p813_p3 = scmp.lt.s32.totalorder %s807_s5, %s807_s5 }
  0x26   :  { %p814_p4 = por %p813_p3, %p812_p2 }
  0x28   :  { %p815_p5 = pnand %p814_p4, %p808_p1 }
  0x2a   :  { %818 = shalt.err (!%p815_p5)
}
  0x2b   :  { %55 = dma.hbm_to_vmem [thread:$0]  %s1012_s3, 1024, %s50_s24, [#allocation6], %s869_s14, %s869_s14, %s870_s15  }
  0x2c   :  { %s873_s29 = smov [#allocation10]  }
  0x2d   :  { %s77_s30 = sshll.u32 %s873_s29, 4  ;;  %s78_s30 = int_to_ptr.vmem [resolvable:$true] %s77_s30 }
  0x2e   :  { %s827_s10 = scalar_lea.vmem %s78_s30, 1024  ;;  %p832_p7 = scmp.lt.s32.totalorder %s78_s30, %s78_s30 }
  0x2f   :  { %p828_p6 = scmp.ne.s32.totalorder %s78_s30, %s827_s10  ;;  %p833_p8 = scmp.lt.s32.totalorder %s827_s10, %s827_s10 }
  0x31   :  { %p834_p9 = por %p833_p8, %p832_p7 }
  0x33   :  { %p835_p10 = pnand %p834_p9, %p828_p6 }
  0x35   :  { %838 = shalt.err (!%p835_p10)
}
  0x36   :  { %83 = dma.hbm_to_vmem [thread:$0]  %s1016_s7, 1024, %s78_s30, [#allocation9], %s869_s14, %s869_s14, %s870_s15  }
  0x37   :  { %859 = dma.done.wait [#allocation3], 128  }
  0x38   :  { %860 = vsyncadd [#allocation3], 4294967168 }
  0x39   :  { %861 = dma.done.wait [#allocation6], 1280  }
  0x3a   :  { %862 = vsyncadd [#allocation6], 4294966016 }
  0x3b   :  { %863 = dma.done.wait [#allocation9], 2048  }
  0x3c   :  { %864 = vsyncadd [#allocation9], 4294965248  ;;  %v874_v0 = vmov 0.0   ;;  %vm875_vm0 = vmmov 0   ;;  %v700_v1 = vld [vmem:[#allocation5 + $0x8] sm:$0xff]   ;;  %v701_v2 = vld [vmem:[#allocation5] sm:$0xff]  }
  0x3d   :  { %622 = vmatprep.subr.bf16.mxu0 %v874_v0  ;;  %626 = vmatprep.mubr.msk.bf16.mxu0 %vm875_vm0, %v874_v0  ;;  %v703_v3 = vld [vmem:[#allocation7 + $0x38] sm:$0xff]   ;;  %v702_v4 = vld [vmem:[#allocation2] sm:$0xff]   ;;  %vm132_vm1 = vcmask 261120   ;;  %v704_v5 = vld [vmem:[#allocation7 + $0x30] sm:$0xff]  }
  0x3e   :  { %630 = vmatprep.subr.bf16.mxu1 %v874_v0  ;;  %646 = vmatprep.mubr.msk.bf16.mxu1 %vm875_vm0, %v874_v0  ;;  %v705_v6 = vld [vmem:[#allocation7 + $0x28] sm:$0xff]   ;;  %v706_v7 = vld [vmem:[#allocation7 + $0x20] sm:$0xff]   ;;  %v707_v8 = vld [vmem:[#allocation7 + $0x18] sm:$0xff]  }
  0x3f   :  { %623 = vmatpush3.bf16.msra.mxu0 %v700_v1  ;;  %631 = vmatpush3.bf16.msra.mxu1 %v703_v3  ;;  %v708_v9 = vld [vmem:[#allocation7 + $0x10] sm:$0xff]   ;;  %v709_v10 = vld [vmem:[#allocation7 + $0x8] sm:$0xff]   ;;  %v710_v11 = vld [vmem:[#allocation7] sm:$0xff]  }
  0x40   :  { %624 = vmatprep.subr.bf16.mxu0 %v874_v0  ;;  %632 = vmatprep.subr.bf16.mxu1 %v874_v0  ;;  %v711_v12 = vld [vmem:[#allocation8 + $0x38] sm:$0xff]   ;;  %v712_v13 = vld [vmem:[#allocation8 + $0x30] sm:$0xff]   ;;  %v551_v14 = vld [vmem:[%s1011_s2] ss:$0 sm:$0xff] }
  0x41   :  { %v713_v24 = vld [vmem:[#allocation8 + $0x28] sm:$0xff]   ;;  %v714_v25 = vld [vmem:[#allocation8 + $0x20] sm:$0xff]   ;;  %v715_v26 = vld [vmem:[#allocation8 + $0x18] sm:$0xff]  }
  0x42   :  { %v716_v27 = vld [vmem:[#allocation8 + $0x10] sm:$0xff]   ;;  %v717_v28 = vld [vmem:[#allocation8 + $0x8] sm:$0xff]   ;;  %v718_v29 = vld [vmem:[#allocation8] sm:$0xff]  }
  0x43   :  { %625 = vmatpush3.bf16.msra.mxu0 %v701_v2  ;;  %633 = vmatpush3.bf16.msra.mxu1 %v704_v5  ;;  %v719_v30 = vld [vmem:[#allocation10 + $0x38] sm:$0xff]   ;;  %v720_v31 = vld [vmem:[#allocation10 + $0x30] sm:$0xff]   ;;  %v556_v32 = vld [vmem:[%s1013_s4] ss:$0 sm:$0xff] }
  0x44   :  { %650 = vmatprep.subr.bf16.mxu0 %v874_v0  ;;  %634 = vmatprep.subr.bf16.mxu1 %v874_v0  ;;  %v721_v42 = vld [vmem:[#allocation10 + $0x28] sm:$0xff]   ;;  %v722_v43 = vld [vmem:[#allocation10 + $0x20] sm:$0xff]   ;;  %v723_v44 = vld [vmem:[#allocation10 + $0x18] sm:$0xff]  }
  0x45   :  { %v724_v45 = vld [vmem:[#allocation10 + $0x10] sm:$0xff]   ;;  %v725_v46 = vld [vmem:[#allocation10 + $0x8] sm:$0xff]   ;;  %v726_v47 = vld [vmem:[#allocation10] sm:$0xff]  }
  0x46   :  { %627 = vmatmul.mubr.msk.bf16.vlgmr.msra.gmra.mxu0 %vm132_vm1, %v702_v4  ;;  %v565_v48 = vld [vmem:[%s1015_s6] ss:$0 sm:$0xff]  ;;  %s876_s6 = smov [#allocation11]  }
  0x47   :  { %666 = vmatprep.mubr.msk.bf16.mxu0 %vm875_vm0, %v874_v0  ;;  %635 = vmatpush3.bf16.msra.mxu1 %v705_v6  ;;  %v574_v59 = vld [vmem:[%s1017_s8] ss:$0 sm:$0xff]  ;;  %s537_s18 = sshll.u32 %s876_s6, 4  ;;  %s538_s18 = int_to_ptr.vmem [resolvable:$true] %s537_s18 }
  0x48   :  { %636 = vmatprep.subr.bf16.mxu1 %v874_v0  ;;  %651 = vmatpush3.bf16.msra.mxu0 %v711_v12  ;;  %s839_s19 = scalar_lea.vmem %s538_s18, 128  ;;  %p844_p12 = scmp.lt.s32.totalorder %s538_s18, %s538_s18 }
  0x49   :  { %652 = vmatprep.subr.bf16.mxu0 %v874_v0  ;;  %p840_p11 = scmp.ne.s32.totalorder %s538_s18, %s839_s19  ;;  %p845_p13 = scmp.lt.s32.totalorder %s839_s19, %s839_s19 }
  0x4b   :  { %637 = vmatpush3.bf16.msra.mxu1 %v706_v7  ;;  %p846_p0 = por %p845_p13, %p844_p12 }
  0x4c   :  { %638 = vmatprep.subr.bf16.mxu1 %v874_v0  ;;  %653 = vmatpush3.bf16.msra.mxu0 %v712_v13 }
  0x4d   :  { %654 = vmatprep.subr.bf16.mxu0 %v874_v0  ;;  %p847_p1 = pnand %p846_p0, %p840_p11 }
  0x4f   :  { %639 = vmatpush3.bf16.msra.mxu1 %v707_v8 }
  0x50   :  { %640 = vmatprep.subr.bf16.mxu1 %v874_v0  ;;  %655 = vmatpush3.bf16.msra.mxu0 %v713_v24 }
  0x51   :  { %656 = vmatprep.subr.bf16.mxu0 %v874_v0 }
  0x53   :  { %641 = vmatpush3.bf16.msra.mxu1 %v708_v9 }
  0x54   :  { %642 = vmatprep.subr.bf16.mxu1 %v874_v0  ;;  %657 = vmatpush3.bf16.msra.mxu0 %v714_v25 }
  0x55   :  { %658 = vmatprep.subr.bf16.mxu0 %v874_v0 }
  0x57   :  { %643 = vmatpush3.bf16.msra.mxu1 %v709_v10 }
  0x58   :  { %644 = vmatprep.subr.bf16.mxu1 %v874_v0  ;;  %659 = vmatpush3.bf16.msra.mxu0 %v715_v26 }
  0x59   :  { %660 = vmatprep.subr.bf16.mxu0 %v874_v0 }
  0x5b   :  { %645 = vmatpush3.bf16.msra.mxu1 %v710_v11 }
  0x5c   :  { %670 = vmatprep.subr.bf16.mxu1 %v874_v0  ;;  %661 = vmatpush3.bf16.msra.mxu0 %v716_v27 }
  0x5d   :  { %662 = vmatprep.subr.bf16.mxu0 %v874_v0 }
  0x60   :  { %663 = vmatpush3.bf16.msra.mxu0 %v717_v28 }
  0x61   :  { %664 = vmatprep.subr.bf16.mxu0 %v874_v0 }
  0x64   :  { %665 = vmatpush3.bf16.msra.mxu0 %v718_v29 }
 0x106   :  { %v170_v15 = vpop.f32.mrf.mxu0 }
 0x107   :  { %v171_v16 = vadd.f32 %v551_v14, %v170_v15 }
 0x108   :  { %v628_v17 = vpop.f32.mrf.mxu0 }
 0x109   :  { %727 = vtanh.f32 %v171_v16 }
 0x10a   :  { %v173_v18 = vpop.f32.mrf.mxu0 }
 0x10b   :  { %v174_v19 = vadd.f32 %v551_v14, %v173_v18 }
 0x10c   :  { %v629_v20 = vpop.f32.mrf.mxu0 }
 0x10d   :  { %729 = vtanh.f32 %v174_v19 }
 0x116   :  { %v728_v21 = vpop.eup %727 }
 0x11a   :  { %v730_v22 = vpop.eup %729 }
 0x11b   :  { %v179_v23 = vpack.c.bf16 %v730_v22, %v728_v21 }
 0x11d   :  { %647 = vmatmul.mubr.bf16.vlgmr.msra.gmra.mxu1 %v179_v23 }
 0x11e   :  { %686 = vmatprep.mubr.msk.bf16.mxu1 %vm875_vm0, %v874_v0  ;;  %671 = vmatpush3.bf16.msra.mxu1 %v719_v30 }
 0x11f   :  { %672 = vmatprep.subr.bf16.mxu1 %v874_v0 }
 0x122   :  { %673 = vmatpush3.bf16.msra.mxu1 %v720_v31 }
 0x123   :  { %674 = vmatprep.subr.bf16.mxu1 %v874_v0 }
 0x126   :  { %675 = vmatpush3.bf16.msra.mxu1 %v721_v42 }
 0x127   :  { %676 = vmatprep.subr.bf16.mxu1 %v874_v0 }
 0x12a   :  { %677 = vmatpush3.bf16.msra.mxu1 %v722_v43 }
 0x12b   :  { %678 = vmatprep.subr.bf16.mxu1 %v874_v0 }
 0x12e   :  { %679 = vmatpush3.bf16.msra.mxu1 %v723_v44 }
 0x12f   :  { %680 = vmatprep.subr.bf16.mxu1 %v874_v0 }
 0x132   :  { %681 = vmatpush3.bf16.msra.mxu1 %v724_v45 }
 0x133   :  { %682 = vmatprep.subr.bf16.mxu1 %v874_v0 }
 0x136   :  { %683 = vmatpush3.bf16.msra.mxu1 %v725_v46 }
 0x137   :  { %684 = vmatprep.subr.bf16.mxu1 %v874_v0 }
 0x13a   :  { %685 = vmatpush3.bf16.msra.mxu1 %v726_v47 }
 0x1dd   :  { %v285_v33 = vpop.f32.mrf.mxu1 }
 0x1de   :  { %v286_v34 = vadd.f32 %v556_v32, %v285_v33 }
 0x1df   :  { %v648_v35 = vpop.f32.mrf.mxu1 }
 0x1e0   :  { %731 = vtanh.f32 %v286_v34 }
 0x1e1   :  { %v288_v36 = vpop.f32.mrf.mxu1 }
 0x1e2   :  { %v289_v37 = vadd.f32 %v556_v32, %v288_v36 }
 0x1e3   :  { %v649_v38 = vpop.f32.mrf.mxu1 }
 0x1e4   :  { %733 = vtanh.f32 %v289_v37 }
 0x1ed   :  { %v732_v39 = vpop.eup %731 }
 0x1f1   :  { %v734_v40 = vpop.eup %733 }
 0x1f2   :  { %v294_v41 = vpack.c.bf16 %v734_v40, %v732_v39 }
 0x1f4   :  { %667 = vmatmul.mubr.bf16.vlgmr.msra.gmra.mxu0 %v294_v41 }
 0x2b4   :  { %v400_v49 = vpop.f32.mrf.mxu0 }
 0x2b5   :  { %v401_v50 = vadd.f32 %v565_v48, %v400_v49 }
 0x2b6   :  { %v668_v51 = vpop.f32.mrf.mxu0 }
 0x2b7   :  { %735 = vtanh.f32 %v401_v50 }
 0x2b8   :  { %v403_v52 = vpop.f32.mrf.mxu0 }
 0x2b9   :  { %v404_v53 = vadd.f32 %v565_v48, %v403_v52 }
 0x2ba   :  { %v669_v54 = vpop.f32.mrf.mxu0 }
 0x2bb   :  { %737 = vtanh.f32 %v404_v53 }
 0x2c4   :  { %v736_v55 = vpop.eup %735 }
 0x2c8   :  { %v738_v56 = vpop.eup %737 }
 0x2c9   :  { %v409_v57 = vpack.c.bf16 %v738_v56, %v736_v55 }
 0x2cb   :  { %687 = vmatmul.mubr.bf16.vlgmr.msra.gmra.mxu1 %v409_v57 }
 0x38b   :  { %v515_v58 = vpop.f32.mrf.mxu1 }
 0x38c   :  { %v516_v62 = vadd.f32 %v574_v59, %v515_v58 }
 0x38d   :  { %v688_v60 = vpop.f32.mrf.mxu1 }
 0x38f   :  { %v518_v61 = vpop.f32.mrf.mxu1 }
 0x390   :  { %v519_v63 = vadd.f32 %v574_v59, %v518_v61 }
 0x391   :  { %v689_v0 = vpop.f32.mrf.mxu1 }
 0x392   :  { %v590_v1 = vpack.c.bf16 %v519_v63, %v516_v62 }
 0x394   :  { %591 = vst [vmem:[#allocation11] sm:$0xff] %v590_v1  }
 0x395   :  { %850 = shalt.err (!%p847_p1)
}
 0x396   :  { %543 = dma.vmem_to_hbm [thread:$0]  %s538_s18, 128, %s1018_s9, [#allocation4], %s869_s14, %s869_s14, %s870_s15  }
 0x397   :  { %865 = dma.done.wait [#allocation4], 128  }
 0x398   :  { %866 = vsyncadd [#allocation4], 4294967168 }
 0x399   :  { %547 = vsyncpa [#allocation3], 1 }
 0x39a   :  { %548 = vsyncpa [#allocation6], 1 }
 0x39b   :  { %549 = vsyncpa [#allocation9], 1 }
 0x39c   :  { %550 = vsyncpa [#allocation4], 1 }

// kernel: tpu_custom_call.1
= control target key start
LH: loop header
LB: loop body
LE: loop exit
PB: predicated region body
PF: predicated region fallthrough
CT: control target
= control target key end

     0   :  { %14 = vsyncpa [#allocation3], 0  ;;  %s1009_s0 = inlined_call_operand.hbm [shape: bf16[16,32], index: 0, kind: input, shape index: {}]   ;;  %s1010_s1 = inlined_call_operand.hbm [shape: bf16[32,128], index: 1, kind: input, shape index: {}]   ;;  %s1011_s2 = inlined_call_operand.vmem [shape: f32[1,128], index: 2, kind: input, shape index: {}]   ;;  %s1012_s3 = inlined_call_operand.hbm [shape: bf16[128,128], index: 3, kind: input, shape index: {}]   ;;  %s1013_s4 = inlined_call_operand.vmem [shape: f32[1,128], index: 4, kind: input, shape index: {}]   ;;  %s1014_s5 = inlined_call_operand.hbm [shape: bf16[128,128], index: 5, kind: input, shape index: {}]   ;;  %s1015_s6 = inlined_call_operand.vmem [shape: f32[1,128], index: 6, kind: input, shape index: {}]   ;;  %s1016_s7 = inlined_call_operand.hbm [shape: bf16[128,128], index: 7, kind: input, shape index: {}]   ;;  %s1017_s8 = inlined_call_operand.vmem [shape: f32[1,128], index: 8, kind: input, shape index: {}]   ;;  %s1018_s9 = inlined_call_operand.hbm [shape: bf16[16,128], index: 9, kind: output, shape index: {}]  }
   0x1   :  { %15 = vsyncpa [#allocation6], 0 }
   0x2   :  { %16 = vsyncpa [#allocation9], 0 }
   0x3   :  { %17 = vsyncpa [#allocation4], 0  ;;  %s867_s30 = smov [#allocation5]   ;;  %s868_s11 = smov [#allocation8]  }
   0x4   :  { %s35_s10 = sshll.u32 %s867_s30, 4  ;;  %s63_s12 = sshll.u32 %s868_s11, 4  ;;  %s36_s10 = int_to_ptr.vmem [resolvable:$true] %s35_s10  ;;  %s64_s12 = int_to_ptr.vmem [resolvable:$true] %s63_s12 }
   0x5   :  { %s747_s13 = scalar_lea.vmem %s36_s10, 256  ;;  %p752_p1 = scmp.lt.s32.totalorder %s36_s10, %s36_s10 }
   0x6   :  { %p748_p0 = scmp.ne.s32.totalorder %s36_s10, %s747_s13  ;;  %p753_p2 = scmp.lt.s32.totalorder %s747_s13, %s747_s13 }
   0x8   :  { %p754_p3 = por %p753_p2, %p752_p1 }
   0xa   :  { %p755_p4 = pnand %p754_p3, %p748_p0 }
   0xc   :  { %758 = shalt.err (!%p755_p4)
}
   0xd   :  { %s869_s14 = smov 64   ;;  %s870_s15 = smov 4  }
   0xe   :  { %41 = dma.hbm_to_vmem [thread:$0]  %s1010_s1, 256, %s36_s10, [#allocation6], %s869_s14, %s869_s14, %s870_s15  }
   0xf   :  { %s767_s18 = scalar_lea.vmem %s64_s12, 1024  ;;  %p772_p6 = scmp.lt.s32.totalorder %s64_s12, %s64_s12 }
  0x10   :  { %p768_p5 = scmp.ne.s32.totalorder %s64_s12, %s767_s18  ;;  %p773_p7 = scmp.lt.s32.totalorder %s767_s18, %s767_s18 }
  0x12   :  { %p774_p8 = por %p773_p7, %p772_p6 }
  0x14   :  { %p775_p9 = pnand %p774_p8, %p768_p5 }
  0x16   :  { %778 = shalt.err (!%p775_p9)
}
  0x17   :  { %69 = dma.hbm_to_vmem [thread:$0]  %s1014_s5, 1024, %s64_s12, [#allocation9], %s869_s14, %s869_s14, %s870_s15  }
  0x18   :  { %s871_s21 = smov [#allocation2]   ;;  %s872_s23 = smov [#allocation7]  }
  0x19   :  { %s23_s22 = sshll.u32 %s871_s21, 4  ;;  %s49_s24 = sshll.u32 %s872_s23, 4  ;;  %s24_s22 = int_to_ptr.vmem [resolvable:$true] %s23_s22  ;;  %s50_s24 = int_to_ptr.vmem [resolvable:$true] %s49_s24 }
  0x1a   :  { %s787_s1 = scalar_lea.vmem %s24_s22, 128  ;;  %p792_p11 = scmp.lt.s32.totalorder %s24_s22, %s24_s22 }
  0x1b   :  { %p788_p10 = scmp.ne.s32.totalorder %s24_s22, %s787_s1  ;;  %p793_p12 = scmp.lt.s32.totalorder %s787_s1, %s787_s1 }
  0x1d   :  { %p794_p13 = por %p793_p12, %p792_p11 }
  0x1f   :  { %p795_p0 = pnand %p794_p13, %p788_p10 }
  0x21   :  { %798 = shalt.err (!%p795_p0)
}
  0x22   :  { %29 = dma.hbm_to_vmem [thread:$0]  %s1009_s0, 128, %s24_s22, [#allocation3], %s869_s14, %s869_s14, %s870_s15  }
  0x23   :  { %s807_s5 = scalar_lea.vmem %s50_s24, 1024  ;;  %p812_p2 = scmp.lt.s32.totalorder %s50_s24, %s50_s24 }
  0x24   :  { %p808_p1 = scmp.ne.s32.totalorder %s50_s24, %s807_s5  ;;  %p813_p3 = scmp.lt.s32.totalorder %s807_s5, %s807_s5 }
  0x26   :  { %p814_p4 = por %p813_p3, %p812_p2 }
  0x28   :  { %p815_p5 = pnand %p814_p4, %p808_p1 }
  0x2a   :  { %818 = shalt.err (!%p815_p5)
}
  0x2b   :  { %55 = dma.hbm_to_vmem [thread:$0]  %s1012_s3, 1024, %s50_s24, [#allocation6], %s869_s14, %s869_s14, %s870_s15  }
  0x2c   :  { %s873_s29 = smov [#allocation10]  }
  0x2d   :  { %s77_s30 = sshll.u32 %s873_s29, 4  ;;  %s78_s30 = int_to_ptr.vmem [resolvable:$true] %s77_s30 }
  0x2e   :  { %s827_s10 = scalar_lea.vmem %s78_s30, 1024  ;;  %p832_p7 = scmp.lt.s32.totalorder %s78_s30, %s78_s30 }
  0x2f   :  { %p828_p6 = scmp.ne.s32.totalorder %s78_s30, %s827_s10  ;;  %p833_p8 = scmp.lt.s32.totalorder %s827_s10, %s827_s10 }
  0x31   :  { %p834_p9 = por %p833_p8, %p832_p7 }
  0x33   :  { %p835_p10 = pnand %p834_p9, %p828_p6 }
  0x35   :  { %838 = shalt.err (!%p835_p10)
}
  0x36   :  { %83 = dma.hbm_to_vmem [thread:$0]  %s1016_s7, 1024, %s78_s30, [#allocation9], %s869_s14, %s869_s14, %s870_s15  }
  0x37   :  { %859 = dma.done.wait [#allocation3], 128  }
  0x38   :  { %860 = vsyncadd [#allocation3], 4294967168 }
  0x39   :  { %861 = dma.done.wait [#allocation6], 1280  }
  0x3a   :  { %862 = vsyncadd [#allocation6], 4294966016 }
  0x3b   :  { %863 = dma.done.wait [#allocation9], 2048  }
  0x3c   :  { %864 = vsyncadd [#allocation9], 4294965248  ;;  %v874_v0 = vmov 0.0   ;;  %vm875_vm0 = vmmov 0   ;;  %v700_v1 = vld [vmem:[#allocation5 + $0x8] sm:$0xff]   ;;  %v701_v2 = vld [vmem:[#allocation5] sm:$0xff]  }
  0x3d   :  { %622 = vmatprep.subr.bf16.mxu0 %v874_v0  ;;  %626 = vmatprep.mubr.msk.bf16.mxu0 %vm875_vm0, %v874_v0  ;;  %v703_v3 = vld [vmem:[#allocation7 + $0x38] sm:$0xff]   ;;  %v702_v4 = vld [vmem:[#allocation2] sm:$0xff]   ;;  %vm132_vm1 = vcmask 261120   ;;  %v704_v5 = vld [vmem:[#allocation7 + $0x30] sm:$0xff]  }
  0x3e   :  { %630 = vmatprep.subr.bf16.mxu1 %v874_v0  ;;  %646 = vmatprep.mubr.msk.bf16.mxu1 %vm875_vm0, %v874_v0  ;;  %v705_v6 = vld [vmem:[#allocation7 + $0x28] sm:$0xff]   ;;  %v706_v7 = vld [vmem:[#allocation7 + $0x20] sm:$0xff]   ;;  %v707_v8 = vld [vmem:[#allocation7 + $0x18] sm:$0xff]  }
  0x3f   :  { %623 = vmatpush3.bf16.msra.mxu0 %v700_v1  ;;  %631 = vmatpush3.bf16.msra.mxu1 %v703_v3  ;;  %v708_v9 = vld [vmem:[#allocation7 + $0x10] sm:$0xff]   ;;  %v709_v10 = vld [vmem:[#allocation7 + $0x8] sm:$0xff]   ;;  %v710_v11 = vld [vmem:[#allocation7] sm:$0xff]  }
  0x40   :  { %624 = vmatprep.subr.bf16.mxu0 %v874_v0  ;;  %632 = vmatprep.subr.bf16.mxu1 %v874_v0  ;;  %v711_v12 = vld [vmem:[#allocation8 + $0x38] sm:$0xff]   ;;  %v712_v13 = vld [vmem:[#allocation8 + $0x30] sm:$0xff]   ;;  %v551_v14 = vld [vmem:[%s1011_s2] ss:$0 sm:$0xff] }
  0x41   :  { %v713_v24 = vld [vmem:[#allocation8 + $0x28] sm:$0xff]   ;;  %v714_v25 = vld [vmem:[#allocation8 + $0x20] sm:$0xff]   ;;  %v715_v26 = vld [vmem:[#allocation8 + $0x18] sm:$0xff]  }
  0x42   :  { %v716_v27 = vld [vmem:[#allocation8 + $0x10] sm:$0xff]   ;;  %v717_v28 = vld [vmem:[#allocation8 + $0x8] sm:$0xff]   ;;  %v718_v29 = vld [vmem:[#allocation8] sm:$0xff]  }
  0x43   :  { %625 = vmatpush3.bf16.msra.mxu0 %v701_v2  ;;  %633 = vmatpush3.bf16.msra.mxu1 %v704_v5  ;;  %v719_v30 = vld [vmem:[#allocation10 + $0x38] sm:$0xff]   ;;  %v720_v31 = vld [vmem:[#allocation10 + $0x30] sm:$0xff]   ;;  %v556_v32 = vld [vmem:[%s1013_s4] ss:$0 sm:$0xff] }
  0x44   :  { %650 = vmatprep.subr.bf16.mxu0 %v874_v0  ;;  %634 = vmatprep.subr.bf16.mxu1 %v874_v0  ;;  %v721_v42 = vld [vmem:[#allocation10 + $0x28] sm:$0xff]   ;;  %v722_v43 = vld [vmem:[#allocation10 + $0x20] sm:$0xff]   ;;  %v723_v44 = vld [vmem:[#allocation10 + $0x18] sm:$0xff]  }
  0x45   :  { %v724_v45 = vld [vmem:[#allocation10 + $0x10] sm:$0xff]   ;;  %v725_v46 = vld [vmem:[#allocation10 + $0x8] sm:$0xff]   ;;  %v726_v47 = vld [vmem:[#allocation10] sm:$0xff]  }
  0x46   :  { %627 = vmatmul.mubr.msk.bf16.vlgmr.msra.gmra.mxu0 %vm132_vm1, %v702_v4  ;;  %v565_v48 = vld [vmem:[%s1015_s6] ss:$0 sm:$0xff]  ;;  %s876_s6 = smov [#allocation11]  }
  0x47   :  { %666 = vmatprep.mubr.msk.bf16.mxu0 %vm875_vm0, %v874_v0  ;;  %635 = vmatpush3.bf16.msra.mxu1 %v705_v6  ;;  %v574_v59 = vld [vmem:[%s1017_s8] ss:$0 sm:$0xff]  ;;  %s537_s18 = sshll.u32 %s876_s6, 4  ;;  %s538_s18 = int_to_ptr.vmem [resolvable:$true] %s537_s18 }
  0x48   :  { %636 = vmatprep.subr.bf16.mxu1 %v874_v0  ;;  %651 = vmatpush3.bf16.msra.mxu0 %v711_v12  ;;  %s839_s19 = scalar_lea.vmem %s538_s18, 128  ;;  %p844_p12 = scmp.lt.s32.totalorder %s538_s18, %s538_s18 }
  0x49   :  { %652 = vmatprep.subr.bf16.mxu0 %v874_v0  ;;  %p840_p11 = scmp.ne.s32.totalorder %s538_s18, %s839_s19  ;;  %p845_p13 = scmp.lt.s32.totalorder %s839_s19, %s839_s19 }
  0x4b   :  { %637 = vmatpush3.bf16.msra.mxu1 %v706_v7  ;;  %p846_p0 = por %p845_p13, %p844_p12 }
  0x4c   :  { %638 = vmatprep.subr.bf16.mxu1 %v874_v0  ;;  %653 = vmatpush3.bf16.msra.mxu0 %v712_v13 }
  0x4d   :  { %654 = vmatprep.subr.bf16.mxu0 %v874_v0  ;;  %p847_p1 = pnand %p846_p0, %p840_p11 }
  0x4f   :  { %639 = vmatpush3.bf16.msra.mxu1 %v707_v8 }
  0x50   :  { %640 = vmatprep.subr.bf16.mxu1 %v874_v0  ;;  %655 = vmatpush3.bf16.msra.mxu0 %v713_v24 }
  0x51   :  { %656 = vmatprep.subr.bf16.mxu0 %v874_v0 }
  0x53   :  { %641 = vmatpush3.bf16.msra.mxu1 %v708_v9 }
  0x54   :  { %642 = vmatprep.subr.bf16.mxu1 %v874_v0  ;;  %657 = vmatpush3.bf16.msra.mxu0 %v714_v25 }
  0x55   :  { %658 = vmatprep.subr.bf16.mxu0 %v874_v0 }
  0x57   :  { %643 = vmatpush3.bf16.msra.mxu1 %v709_v10 }
  0x58   :  { %644 = vmatprep.subr.bf16.mxu1 %v874_v0  ;;  %659 = vmatpush3.bf16.msra.mxu0 %v715_v26 }
  0x59   :  { %660 = vmatprep.subr.bf16.mxu0 %v874_v0 }
  0x5b   :  { %645 = vmatpush3.bf16.msra.mxu1 %v710_v11 }
  0x5c   :  { %670 = vmatprep.subr.bf16.mxu1 %v874_v0  ;;  %661 = vmatpush3.bf16.msra.mxu0 %v716_v27 }
  0x5d   :  { %662 = vmatprep.subr.bf16.mxu0 %v874_v0 }
  0x60   :  { %663 = vmatpush3.bf16.msra.mxu0 %v717_v28 }
  0x61   :  { %664 = vmatprep.subr.bf16.mxu0 %v874_v0 }
  0x64   :  { %665 = vmatpush3.bf16.msra.mxu0 %v718_v29 }
 0x106   :  { %v170_v15 = vpop.f32.mrf.mxu0 }
 0x107   :  { %v171_v16 = vadd.f32 %v551_v14, %v170_v15 }
 0x108   :  { %v628_v17 = vpop.f32.mrf.mxu0 }
 0x109   :  { %727 = vtanh.f32 %v171_v16 }
 0x10a   :  { %v173_v18 = vpop.f32.mrf.mxu0 }
 0x10b   :  { %v174_v19 = vadd.f32 %v551_v14, %v173_v18 }
 0x10c   :  { %v629_v20 = vpop.f32.mrf.mxu0 }
 0x10d   :  { %729 = vtanh.f32 %v174_v19 }
 0x116   :  { %v728_v21 = vpop.eup %727 }
 0x11a   :  { %v730_v22 = vpop.eup %729 }
 0x11b   :  { %v179_v23 = vpack.c.bf16 %v730_v22, %v728_v21 }
 0x11d   :  { %647 = vmatmul.mubr.bf16.vlgmr.msra.gmra.mxu1 %v179_v23 }
 0x11e   :  { %686 = vmatprep.mubr.msk.bf16.mxu1 %vm875_vm0, %v874_v0  ;;  %671 = vmatpush3.bf16.msra.mxu1 %v719_v30 }
 0x11f   :  { %672 = vmatprep.subr.bf16.mxu1 %v874_v0 }
 0x122   :  { %673 = vmatpush3.bf16.msra.mxu1 %v720_v31 }
 0x123   :  { %674 = vmatprep.subr.bf16.mxu1 %v874_v0 }
 0x126   :  { %675 = vmatpush3.bf16.msra.mxu1 %v721_v42 }
 0x127   :  { %676 = vmatprep.subr.bf16.mxu1 %v874_v0 }
 0x12a   :  { %677 = vmatpush3.bf16.msra.mxu1 %v722_v43 }
 0x12b   :  { %678 = vmatprep.subr.bf16.mxu1 %v874_v0 }
 0x12e   :  { %679 = vmatpush3.bf16.msra.mxu1 %v723_v44 }
 0x12f   :  { %680 = vmatprep.subr.bf16.mxu1 %v874_v0 }
 0x132   :  { %681 = vmatpush3.bf16.msra.mxu1 %v724_v45 }
 0x133   :  { %682 = vmatprep.subr.bf16.mxu1 %v874_v0 }
 0x136   :  { %683 = vmatpush3.bf16.msra.mxu1 %v725_v46 }
 0x137   :  { %684 = vmatprep.subr.bf16.mxu1 %v874_v0 }
 0x13a   :  { %685 = vmatpush3.bf16.msra.mxu1 %v726_v47 }
 0x1dd   :  { %v285_v33 = vpop.f32.mrf.mxu1 }
 0x1de   :  { %v286_v34 = vadd.f32 %v556_v32, %v285_v33 }
 0x1df   :  { %v648_v35 = vpop.f32.mrf.mxu1 }
 0x1e0   :  { %731 = vtanh.f32 %v286_v34 }
 0x1e1   :  { %v288_v36 = vpop.f32.mrf.mxu1 }
 0x1e2   :  { %v289_v37 = vadd.f32 %v556_v32, %v288_v36 }
 0x1e3   :  { %v649_v38 = vpop.f32.mrf.mxu1 }
 0x1e4   :  { %733 = vtanh.f32 %v289_v37 }
 0x1ed   :  { %v732_v39 = vpop.eup %731 }
 0x1f1   :  { %v734_v40 = vpop.eup %733 }
 0x1f2   :  { %v294_v41 = vpack.c.bf16 %v734_v40, %v732_v39 }
 0x1f4   :  { %667 = vmatmul.mubr.bf16.vlgmr.msra.gmra.mxu0 %v294_v41 }
 0x2b4   :  { %v400_v49 = vpop.f32.mrf.mxu0 }
 0x2b5   :  { %v401_v50 = vadd.f32 %v565_v48, %v400_v49 }
 0x2b6   :  { %v668_v51 = vpop.f32.mrf.mxu0 }
 0x2b7   :  { %735 = vtanh.f32 %v401_v50 }
 0x2b8   :  { %v403_v52 = vpop.f32.mrf.mxu0 }
 0x2b9   :  { %v404_v53 = vadd.f32 %v565_v48, %v403_v52 }
 0x2ba   :  { %v669_v54 = vpop.f32.mrf.mxu0 }
 0x2bb   :  { %737 = vtanh.f32 %v404_v53 }
 0x2c4   :  { %v736_v55 = vpop.eup %735 }
 0x2c8   :  { %v738_v56 = vpop.eup %737 }
 0x2c9   :  { %v409_v57 = vpack.c.bf16 %v738_v56, %v736_v55 }
 0x2cb   :  { %687 = vmatmul.mubr.bf16.vlgmr.msra.gmra.mxu1 %v409_v57 }
 0x38b   :  { %v515_v58 = vpop.f32.mrf.mxu1 }
 0x38c   :  { %v516_v62 = vadd.f32 %v574_v59, %v515_v58 }
 0x38d   :  { %v688_v60 = vpop.f32.mrf.mxu1 }
 0x38f   :  { %v518_v61 = vpop.f32.mrf.mxu1 }
 0x390   :  { %v519_v63 = vadd.f32 %v574_v59, %v518_v61 }
 0x391   :  { %v689_v0 = vpop.f32.mrf.mxu1 }
 0x392   :  { %v590_v1 = vpack.c.bf16 %v519_v63, %v516_v62 }
 0x394   :  { %591 = vst [vmem:[#allocation11] sm:$0xff] %v590_v1  }
 0x395   :  { %850 = shalt.err (!%p847_p1)
}
 0x396   :  { %543 = dma.vmem_to_hbm [thread:$0]  %s538_s18, 128, %s1018_s9, [#allocation4], %s869_s14, %s869_s14, %s870_s15  }
 0x397   :  { %865 = dma.done.wait [#allocation4], 128  }
 0x398   :  { %866 = vsyncadd [#allocation4], 4294967168 }
 0x399   :  { %547 = vsyncpa [#allocation3], 1 }
 0x39a   :  { %548 = vsyncpa [#allocation6], 1 }
 0x39b   :  { %549 = vsyncpa [#allocation9], 1 }
 0x39c   :  { %550 = vsyncpa [#allocation4], 1 }

</bundles_post_ra>
